<compile_context>
chip_gen: v7x
topology: tpu7x:2x2x1
jax: 0.10.0
libtpu: 0.0.40
codegen_flags: <defaults>
</compile_context>

<pallas_src>
import math
import jax
import jax.numpy as jnp
from jax.experimental import pallas as pl
from jax.experimental.pallas import tpu as pltpu


def _round_up(x: int, mult: int) -> int:
    return ((x + mult - 1) // mult) * mult


def choose_tile_c(num_classes: int, requested: int = 512) -> int:
    """Lane-aligned class tile; >= 2 tiles when possible (v7x megacore)."""
    tile_c = max(128, _round_up(requested, 128))
    # Never overshoot the (padded) class count.
    tile_c = min(tile_c, _round_up(num_classes, 128))
    # Keep at least 2 class tiles so the parallel axis can split across TCs.
    if num_classes > 128:
        tile_c = min(tile_c, max(128, _round_up((num_classes + 1) // 2, 128)))
    return tile_c


def prepare_cosface_weight(weight, *, tile_c: int):
    """One-time (amortized) weight prep: L2-normalize rows in f32, cast to
    bf16, zero-pad to (C_pad, D_pad).  Matches F.normalize(w, p=2, dim=1)."""
    C, D = weight.shape
    C_pad = _round_up(C, tile_c)
    D_pad = _round_up(D, 128)
    w = weight.astype(jnp.float32)
    inv = jax.lax.rsqrt(
        jnp.maximum(jnp.sum(w * w, axis=1, keepdims=True), 1e-24))
    nw = (w * inv).astype(jnp.bfloat16)
    w_prep = jnp.zeros((C_pad, D_pad), jnp.bfloat16).at[:C, :D].set(nw)
    return w_prep


def make_cosface_kernel(s: float, m: float, tile_c: int):
    s_f = float(s)
    sm_f = float(s) * float(m)

    def cosface_kernel(ne_ref, w_ref, label_ref, out_ref):
        # cos = ne @ nw.T without an explicit transpose: contract last dims.
        # Both operands bf16, f32 accumulation on the MXU.
        cos = jax.lax.dot_general(
            ne_ref[...], w_ref[...],
            dimension_numbers=(((1,), (1,)), ((), ())),
            preferred_element_type=jnp.float32)          # (B_pad, TILE_C) f32

        # Margin at the label column: tile-local label vs tile-local iota.
        lbl_local = label_ref[...] - pl.program_id(0) * tile_c   # (B_pad, 1)
        col = jax.lax.broadcasted_iota(jnp.int32, cos.shape, 1)
        margin = jnp.where(col == lbl_local,
                           jnp.float32(sm_f), jnp.float32(0.0))

        # Fused epilogue: (cos - m*mask) * s == cos*s - (s*m)*mask.
        out_ref[...] = (cos * s_f - margin).astype(out_ref.dtype)

    return cosface_kernel


def cosface_forward(embed, w_prep, label, *, num_classes: int,
                    s: float, m: float, tile_c: int):
    """embed: (B, D) f32, w_prep: (C_pad, D_pad) bf16 pre-normalized,
    label: (B,) int -> (B, num_classes) f32."""
    B, D = embed.shape
    C_pad, D_pad = w_prep.shape
    assert C_pad % tile_c == 0
    assert _round_up(D, 128) == D_pad, "weight was prepped for a different D"

    B_pad = _round_up(max(B, 8), 8)             # sublane alignment

    # Per-call embedding normalization (hoisted out of the class-tile loop),
    # bf16 cast for the MXU, zero-padded to aligned shapes.
    e = embed.astype(jnp.float32)
    inv = jax.lax.rsqrt(
        jnp.maximum(jnp.sum(e * e, axis=1, keepdims=True), 1e-24))
    ne = (e * inv).astype(jnp.bfloat16)
    ne_p = jnp.zeros((B_pad, D_pad), jnp.bfloat16).at[:B, :D].set(ne)

    # Padded label rows get -1 (matches no class column); padded weight rows
    # are zero -> zero cosine columns; both sliced off below.
    lbl_p = jnp.full((B_pad, 1), -1, jnp.int32).at[:B, 0].set(
        label.astype(jnp.int32))

    grid = (C_pad // tile_c,)

    # VMEM budget: double-buffered weight tile + output slab, resident
    # embeddings/labels; headroom, capped below v7x's 64 MiB physical VMEM.
    weight_tile_bytes = tile_c * D_pad * 2          # bf16
    out_tile_bytes = B_pad * tile_c * 4             # f32
    resident_bytes = B_pad * D_pad * 2 + B_pad * 128 * 4
    vmem_needed = 2 * weight_tile_bytes + 2 * out_tile_bytes + resident_bytes
    vmem_limit = int(min(48 * 1024 * 1024,
                         max(2 * vmem_needed, 16 * 1024 * 1024)))

    cost = pl.CostEstimate(
        flops=2 * B_pad * C_pad * D_pad,
        transcendentals=0,
        bytes_accessed=(C_pad * D_pad * 2        # weight stream (dominant)
                        + B_pad * D_pad * 2      # resident embeddings
                        + B_pad * 4              # labels
                        + B_pad * C_pad * 4))    # output

    out = pl.pallas_call(
        make_cosface_kernel(s, m, tile_c),
        out_shape=jax.ShapeDtypeStruct((B_pad, C_pad), jnp.float32),
        grid_spec=pltpu.PrefetchScalarGridSpec(
            num_scalar_prefetch=0,
            grid=grid,
            in_specs=[
                # Normalized embeddings: resident across all class tiles.
                pl.BlockSpec((B_pad, D_pad), lambda j: (0, 0)),
                # Pre-normalized bf16 weight rows: streamed, double-buffered.
                pl.BlockSpec((tile_c, D_pad), lambda j: (j, 0)),
                # Labels: tiny resident block.
                pl.BlockSpec((B_pad, 1), lambda j: (0, 0)),
            ],
            out_specs=pl.BlockSpec((B_pad, tile_c), lambda j: (0, j)),
        ),
        compiler_params=pltpu.CompilerParams(
            # Class tiles are independent -> shard across TCs on v7x megacore.
            dimension_semantics=("parallel",),
            vmem_limit_bytes=vmem_limit),
        cost_estimate=cost,
    )(ne_p, w_prep, lbl_p)

    return out[:B, :num_classes]


def base_forward(x, w_base, b_base):
    """Glue 'base' network: flatten NCHW -> linear projection to feature_dim."""
    # TODO(synk): `base` is an arbitrary user-supplied module in the PyTorch
    # spec; modeled here as flatten + linear in plain JAX.
    B = x.shape[0]
    x_flat = x.reshape(B, -1)                    # (B, C*H*W)
    return x_flat @ w_base.T + b_base            # (B, feature_dim)


if __name__ == "__main__":
    # Small shapes consistent with the module; num_classes > TILE_C-min so the
    # class tiling (and the tile-local margin offset) is actually exercised
    # (300 classes -> tile_c=256, grid=(2,)).
    B, C_in, H, W = 2, 4, 16, 16
    feature_dim = 32
    num_classes = 300
    s_scale, m_margin = 64.0, 0.2

    key = jax.random.PRNGKey(0)
    k_x, k_wb, k_bb, k_w, k_lbl = jax.random.split(key, 5)

    # Input image batch (NCHW) and labels.
    x = jax.random.normal(k_x, (B, C_in, H, W), dtype=jnp.float32)
    label = jax.random.randint(k_lbl, (B,), 0, num_classes, dtype=jnp.int32)

    # Deterministic parameter init.
    in_feats = C_in * H * W
    w_base = jax.random.normal(k_wb, (feature_dim, in_feats), jnp.float32) * 0.02
    b_base = jax.random.normal(k_bb, (feature_dim,), jnp.float32) * 0.02

    # CosFace weight: uniform(-stdv, stdv), stdv = 1/sqrt(feature_dim).
    stdv = 1.0 / math.sqrt(feature_dim)
    weight = jax.random.uniform(
        k_w, (num_classes, feature_dim), jnp.float32, minval=-stdv, maxval=stdv)

    # One-time weight prep (amortized across forward calls in real use).
    tile_c = choose_tile_c(num_classes, requested=512)
    w_prep = prepare_cosface_weight(weight, tile_c=tile_c)

    # Forward.
    embed = base_forward(x, w_base, b_base)                          # JAX glue
    out = cosface_forward(embed, w_prep, label, num_classes=num_classes,
                          s=s_scale, m=m_margin, tile_c=tile_c)      # Pallas
    out = jax.block_until_ready(out)

    # Pure-JAX reference (mirrors F.normalize eps semantics).  The kernel's
    # operands are normalized in f32 then rounded to bf16 (same order as the
    # prep/wrapper), so round the reference operands to bf16 as well.
    ne = embed / jnp.maximum(
        jnp.linalg.norm(embed, axis=1, keepdims=True), 1e-12)
    nw = weight / jnp.maximum(
        jnp.linalg.norm(weight, axis=1, keepdims=True), 1e-12)
    ne_b = ne.astype(jnp.bfloat16).astype(jnp.float32)
    nw_b = nw.astype(jnp.bfloat16).astype(jnp.float32)
    ref = ne_b @ nw_b.T
    ref = ref * s_scale - (s_scale * m_margin) * jax.nn.one_hot(
        label, num_classes, dtype=jnp.float32)

    assert out.shape == (B, num_classes)
    assert bool(jnp.all(jnp.isfinite(out)))
    max_err = float(jnp.max(jnp.abs(out - ref)))
    assert jnp.allclose(out, ref, atol=1e-1, rtol=1e-2), f"mismatch: {max_err}"

    print("KERNEL_OK")
</pallas_src>

<mosaic_0001>
module attributes {stable_mosaic.version = 11 : i64} {
  func.func @cosface_kernel(%arg0: i32, %arg1: memref<8x128xbf16, #tpu.memory_space<vmem>>, %arg2: memref<256x128xbf16, #tpu.memory_space<vmem>>, %arg3: memref<8x1xi32, #tpu.memory_space<vmem>>, %arg4: memref<8x256xf32, #tpu.memory_space<vmem>>) attributes {dimension_semantics = [#tpu.dimension_semantics<parallel>], iteration_bounds = array<i64: 2>, scalar_prefetch = 0 : i64, scratch_operands = 0 : i64, tpu.core_type = #tpu.core_type<tc>, window_params = [{pipeline_mode = #tpu.pipeline_mode<synchronous>, transform_indices = @transform_0, window_bounds = array<i64: 8, 128>}, {transform_indices = @transform_1, window_bounds = array<i64: 256, 128>}, {pipeline_mode = #tpu.pipeline_mode<synchronous>, transform_indices = @transform_2, window_bounds = array<i64: 8, 1>}, {transform_indices = @transform_3, window_bounds = array<i64: 8, 256>}]} {
    %c0 = arith.constant 0 : index
    %c0_0 = arith.constant 0 : index
    %0 = vector.load %arg1[%c0, %c0_0] : memref<8x128xbf16, #tpu.memory_space<vmem>>, vector<8x128xbf16>
    %c0_1 = arith.constant 0 : index
    %c0_2 = arith.constant 0 : index
    %1 = vector.load %arg2[%c0_1, %c0_2] : memref<256x128xbf16, #tpu.memory_space<vmem>>, vector<256x128xbf16>
    %cst = arith.constant dense<0.000000e+00> : vector<8x256xf32>
    %2 = tpu.matmul %0, %1, %cst {dimension_numbers = #tpu.dot_dimension_numbers<[1], [1], [0], [0], [0, 0, 1, 0], [], []>} : vector<8x128xbf16>, vector<256x128xbf16>, vector<8x256xf32> -> vector<8x256xf32>
    %c0_3 = arith.constant 0 : index
    %c0_4 = arith.constant 0 : index
    %3 = vector.load %arg3[%c0_3, %c0_4] : memref<8x1xi32, #tpu.memory_space<vmem>>, vector<8x1xi32>
    %c256_i32 = arith.constant 256 : i32
    %4 = arith.muli %arg0, %c256_i32 : i32
    %5 = vector.broadcast %4 : i32 to vector<8x1xi32>
    %6 = arith.subi %3, %5 : vector<8x1xi32>
    %7 = tpu.iota {dimensions = array<i32: 1>} : vector<8x256xi32>
    %8 = vector.broadcast %6 : vector<8x1xi32> to vector<8x256xi32>
    %9 = arith.cmpi eq, %7, %8 : vector<8x256xi32>
    %cst_5 = arith.constant 1.280000e+01 : f32
    %cst_6 = arith.constant 0.000000e+00 : f32
    %10 = vector.broadcast %cst_5 : f32 to vector<8x256xf32>
    %11 = vector.broadcast %cst_6 : f32 to vector<8x256xf32>
    %12 = arith.select %9, %10, %11 : vector<8x256xi1>, vector<8x256xf32>
    %cst_7 = arith.constant 6.400000e+01 : f32
    %13 = vector.broadcast %cst_7 : f32 to vector<8x256xf32>
    %14 = arith.mulf %2, %13 : vector<8x256xf32>
    %15 = arith.subf %14, %12 : vector<8x256xf32>
    %c0_8 = arith.constant 0 : index
    %c0_9 = arith.constant 0 : index
    %16 = vector.load %arg4[%c0_8, %c0_9] : memref<8x256xf32, #tpu.memory_space<vmem>>, vector<8x256xf32>
    tpu.vector_store %arg4[%c0_8, %c0_9], %15 {strides = array<i32>} : memref<8x256xf32, #tpu.memory_space<vmem>>, vector<8x256xf32>,
    return
  }
  func.func @transform_0(%arg0: i32) -> (i32, i32) {
    %c0_i32 = arith.constant 0 : i32
    %c0_i32_0 = arith.constant 0 : i32
    %c0_i32_1 = arith.constant 0 : i32
    return %c0_i32, %c0_i32_0 : i32, i32
  }
  func.func @transform_1(%arg0: i32) -> (i32, i32) {
    %c0_i32 = arith.constant 0 : i32
    %c0_i32_0 = arith.constant 0 : i32
    return %arg0, %c0_i32 : i32, i32
  }
  func.func @transform_2(%arg0: i32) -> (i32, i32) {
    %c0_i32 = arith.constant 0 : i32
    %c0_i32_0 = arith.constant 0 : i32
    %c0_i32_1 = arith.constant 0 : i32
    return %c0_i32, %c0_i32_0 : i32, i32
  }
  func.func @transform_3(%arg0: i32) -> (i32, i32) {
    %c0_i32 = arith.constant 0 : i32
    %c0_i32_0 = arith.constant 0 : i32
    return %c0_i32, %arg0 : i32, i32
  }
}

</mosaic_0001>

<bundles_post_ra>
// kernel: tpu_custom_call.1
= control target key start
LH: loop header
LB: loop body
LE: loop exit
PB: predicated region body
PF: predicated region fallthrough
CT: control target
= control target key end

     0   :  { %8 = vsyncpa [#allocation3], 0  ;;  %s898_s0 = inlined_call_operand.vmem [shape: bf16[8,128], index: 0, kind: input, shape index: {}]   ;;  %s899_s1 = inlined_call_operand.hbm [shape: bf16[512,128], index: 1, kind: input, shape index: {}]   ;;  %s900_s2 = inlined_call_operand.vmem [shape: s32[8,1], index: 2, kind: input, shape index: {}]   ;;  %s901_s3 = inlined_call_operand.hbm [shape: f32[8,512], index: 3, kind: output, shape index: {}]  }
   0x1   :  { %10 = vsyncpa [#allocation3 + $0x1], 0 }
   0x2   :  { %11 = vsyncpa [#allocation4], 0 }
   0x3   :  { %13 = vsyncpa [#allocation4 + $0x1], 0  ;;  %s709_s12 = smov 0   ;;  %s711_s13 = smov 0  }
   0x4   :  { %s713_s14 = smov 0   ;;  %s715_s15 = smov 0  }
   0x5 LB: > { %s730_s16 = sadd.s32 4294967295, %s681_s15   ;;  %s467_s17 = sadd.s32 4294967294, %s681_s15   ;;  %s681_s15 = sphi %s715_s15, %s914_s15   ;;  %s677_s14 = sphi %s713_s14, %s913_s14   ;;  %s673_s13 = sphi %s711_s13, %s912_s13   ;;  %s669_s12 = sphi %s709_s12, %s911_s12  }
   0x6   : > { %s734_s18 = sadd.s32 1, %s681_s15   ;;  %s47_s19 = sadd.s32 1, %s677_s14 }
   0x7   : > { %s44_s20 = ssub.s32 %s681_s15, %s734_s18  ;;  %p54_p0 = scmp.ne.s32.totalorder %s677_s14, %s673_s13 }
   0x8   : > { %p45_p1 = scmp.eq.s32.totalorder %s44_s20, 0  ;;  %p55_p2 = scmp.eq.s32.totalorder %s681_s15, 0 }
   0x9   : > { %p60_p3 = scmp.ne.s32.totalorder %s673_s13, %s669_s12  ;;  %p61_p4 = scmp.eq.s32.totalorder %s730_s16, 0 }
   0xa   : > { %s746_s21 = scalar_select %p45_p1, %s677_s14, %s47_s19  }
   0xb   : > { %p748_p5 = por %p55_p2, %p54_p0  ;;  %p752_p6 = por %p61_p4, %p60_p3 }
   0xc   : > { %p105_p7 = scmp.eq.s32.totalorder %s730_s16, 1  ;;  %p111_p8 = scmp.eq.s32.totalorder %s467_s17, 1 }
   0xd   : > { %p530_p10 = scmp.lt.s32.totalorder %s681_s15, 2  ;;  %s137_s26 = sand.u32 1, %s677_s14  }
   0xe   : > { %p759_p11 = por %p105_p7, %p54_p0  ;;  %p763_p12 = por %p111_p8, %p60_p3 }
   0xf   : > { %s498_s27 = sshll.u32 %s681_s15, 11  ;;  %s470_s28 = sshll.u32 %s137_s26, 7 }
  0x10   : > { %s905_s24 = scalar_select %p759_p11, 1, 0 }
  0x11   : > { %s906_s25 = scalar_select %p763_p12, 1, 0 }
  0x12   : > { %s772_s4 = scalar_lea.hbm %s899_s1, %s498_s27  ;;  %s141_s5 = scalar_lea.vmem [#allocation2], %s470_s28 }
  0x13   : > { %s148_s6 = sshll.u32 %s141_s5, 4  ;;  %p776_p13 = pnand %p530_p10, %p748_p5  ;;  %s780_s6 = int_to_ptr.vmem [resolvable:$true] %s148_s6 }
  0x14   : > { %s782_s8 = scalar_lea.sflag [#allocation3], %s137_s26  ;;  %s585_s9 = scalar_lea.hbm %s772_s4, 2048 }
  0x15   : > { %p586_p0 = scmp.ne.s32.totalorder %s772_s4, %s585_s9  ;;  %p587_p1 = pneg %p776_p13 }
  0x16   : > { %s590_s17 = scalar_lea.hbm %s899_s1, 4096  ;;  %p591_p4 = scmp.lt.u32.totalorder %s772_s4, %s899_s1 }
  0x17   : > { %p588_p2 = pnand %p587_p1, %p586_p0  ;;  %p592_p5 = scmp.lt.u32.totalorder %s590_s17, %s585_s9 }
  0x18   : > { %p594_p8 = scmp.lt.u32.totalorder %s585_s9, %s772_s4 }
  0x19   : > { %p589_p3 = pneg %p588_p2  ;;  %p593_p7 = por %p592_p5, %p591_p4 }
  0x1b   : > { %p595_p10 = por %p594_p8, %p593_p7 }
  0x1d   : > { %p596_p9 = pnand %p595_p10, %p589_p3 }
  0x1f   : > { %599 = shalt.err (!%p596_p9)
}
  0x20   : > { %s600_s22 = scalar_lea.vmem %s780_s6, 2048  ;;  %s683_s26 = smov [#allocation2]  }
  0x21   : > { %p601_p0 = scmp.ne.s32.totalorder %s780_s6, %s600_s22  ;;  %s605_s27 = sshll.u32 %s683_s26, 4  ;;  %s606_s27 = int_to_ptr.vmem [resolvable:$false] %s605_s27 }
  0x22   : > { %s607_s28 = scalar_lea.vmem %s606_s27, 4096  ;;  %p608_p11 = scmp.lt.s32.totalorder %s780_s6, %s606_s27 }
  0x23   : > { %p603_p2 = pnand %p601_p0, %p587_p1  ;;  %p609_p4 = scmp.lt.s32.totalorder %s607_s28, %s600_s22 }
  0x25   : > { %p604_p12 = pneg %p603_p2  ;;  %p610_p5 = por %p609_p4, %p608_p11 }
  0x27   : > { %p611_p7 = pnand %p610_p5, %p604_p12 }
  0x29   : > { %614 = shalt.err (!%p611_p7)
}
  0x2a   : > { %s684_s29 = smov 64   ;;  %s685_s30 = smov 4  }
  0x2b   : > { %525 = dma.hbm_to_vmem [thread:$0]  (!%p776_p13), %s772_s4, 2048, %s780_s6, %s782_s8, %s684_s29, %s684_s29, %s685_s30  }
  0x2c   : > { %p473_p9 = scmp.ge.s32.totalorder %s681_s15, 1  ;;  %p156_p1 = scmp.lt.s32.totalorder %s681_s15, 3 }
  0x2e   : > { %p157_p3 = pnand %p473_p9, %p156_p1 }
  0x2f   : > { %s813_s5 = sand.u32 (!%p157_p3), 1, %s673_s13  }
  0x30   : > { %160 = sbr.rel (%p157_p3) target bundleno = 352 (0x160), region = 32  ;;  %s474_s9 = sshll.u32 (!%p157_p3), %s813_s5, 7 }
  0x31   : > { %s163_s10 = scalar_lea.sflag (!%p157_p3), [#allocation3], %s813_s5  ;;  %s817_s11 = scalar_lea.vmem (!%p157_p3), [#allocation2], %s474_s9 }
  0x37   : > { %660 = dma.done.wait (%p752_p6), %s163_s10, 2048  }
  0x38   : > { %662 = vsyncadd (%p752_p6), %s163_s10, 4294965248  ;;  %v686_v0 = vmov 0   ;;  %v569_v1 = vld [vmem:[%s817_s11 + $0x40] sm:$0xff]   ;;  %v571_v3 = vld [vmem:[%s817_s11 + $0x48] sm:$0xff]   ;;  %s492_s23 = sshll.u32 %s730_s16, 8  ;;  %v366_v21 = vlaneseq  ;;  %s475_s17 = sshll.u32 %s813_s5, 4 }
  0x39   : > { %568 = vset.pattern.permute.xlu0 %v686_v0  ;;  %v570_v2 = vld [vmem:[%s817_s11] sm:$0xff]   ;;  %500 = vmatprep.subr.bf16.mxu0 %v569_v1  ;;  %v572_v4 = vld [vmem:[%s817_s11 + $0x8] sm:$0xff]   ;;  %v573_v5 = vld [vmem:[%s817_s11 + $0x50] sm:$0xff]   ;;  %v364_v6 = vstv %s492_s23  ;;  %v687_v25 = vmov 0.0   ;;  %s188_s19 = scalar_lea.vmem [#allocation5], %s475_s17  ;;  %s854_s27 = scalar_lea.hbm %s901_s3, %s492_s23 }
  0x3a   : > { %501 = vmatpush3.bf16.xpose.msra.mxu0 %v570_v2  ;;  %v574_v7 = vld [vmem:[%s817_s11 + $0x10] sm:$0xff]   ;;  %v575_v8 = vld [vmem:[%s817_s11 + $0x58] sm:$0xff]   ;;  %v192_v9 = vld [vmem:[%s898_s0] sm:$0xf]  ;;  %v367_v22 = vand.u32 127, %v366_v21  ;;  %s397_s20 = sshll.u32 %s188_s19, 4  ;;  %s856_s20 = int_to_ptr.vmem [resolvable:$true] %s397_s20 }
  0x3b   : > { %502 = vmatprep.subr.bf16.mxu0 %v571_v3  ;;  %v362_v10 = vld [vmem:[%s900_s2] sm:$0xff]  ;;  %516 = vmatprep.mubr.bf16.mxu0 %v192_v9  ;;  %v576_v12 = vld [vmem:[%s817_s11 + $0x18] sm:$0xff]   ;;  %v579_v15 = vld [vmem:[%s817_s11 + $0x68] sm:$0xff]   ;;  %s383_s28 = scalar_lea.sflag [#allocation4], %s813_s5  ;;  %s615_s29 = scalar_lea.vmem %s856_s20, 256 }
  0x3c   : > { %v365_v11 = vsub.s32 %v362_v10, %v364_v6  ;;  %v577_v13 = vld [vmem:[%s817_s11 + $0x60] sm:$0xff]   ;;  %v580_v16 = vld [vmem:[%s817_s11 + $0x28] sm:$0xff]   ;;  %v581_v17 = vld [vmem:[%s817_s11 + $0x70] sm:$0xff]   ;;  %v368_v23 = vadd.s32 128, %v367_v22  ;;  %p616_p6 = scmp.ne.s32.totalorder %s856_s20, %s615_s29  ;;  %p908_p11 = scmp.ne.s32.totalorder %s905_s24, 0 }
  0x3d   : > { %v578_v14 = vld [vmem:[%s817_s11 + $0x20] sm:$0xff]   ;;  %v582_v18 = vld [vmem:[%s817_s11 + $0x30] sm:$0xff]   ;;  %v583_v19 = vld [vmem:[%s817_s11 + $0x78] sm:$0xff]   ;;  %s688_s16 = smov [#allocation5]  }
  0x3e   : > { %370 = vperm.xlu0 %568, %v365_v11   ;;  %v584_v20 = vld [vmem:[%s817_s11 + $0x38] sm:$0xff]   ;;  %p617_p12 = pnand %p616_p6, %p908_p11  ;;  %s619_s30 = sshll.u32 %s688_s16, 4  ;;  %s620_s30 = int_to_ptr.vmem [resolvable:$false] %s619_s30 }
  0x3f   : > { %s621_s9 = scalar_lea.vmem %s620_s30, 512  ;;  %p622_p8 = scmp.lt.s32.totalorder %s856_s20, %s620_s30 }
  0x40   : > { %p618_p13 = pneg %p617_p12  ;;  %p623_p10 = scmp.lt.s32.totalorder %s621_s9, %s615_s29 }
  0x42   : > { %503 = vmatpush3.bf16.xpose.msra.mxu0 %v572_v4  ;;  %p624_p0 = por %p623_p10, %p622_p8 }
  0x43   : > { %504 = vmatprep.subr.bf16.mxu0 %v573_v5 }
  0x44   : > { %p625_p2 = pnand %p624_p0, %p618_p13 }
  0x4a   : > { %505 = vmatpush3.bf16.xpose.msra.mxu0 %v574_v7 }
  0x4b   : > { %506 = vmatprep.subr.bf16.mxu0 %v575_v8 }
  0x52   : > { %507 = vmatpush3.bf16.xpose.msra.mxu0 %v576_v12 }
  0x53   : > { %508 = vmatprep.subr.bf16.mxu0 %v577_v13 }
  0x5a   : > { %509 = vmatpush3.bf16.xpose.msra.mxu0 %v578_v14 }
  0x5b   : > { %510 = vmatprep.subr.bf16.mxu0 %v579_v15 }
  0x62   : > { %511 = vmatpush3.bf16.xpose.msra.mxu0 %v580_v16 }
  0x63   : > { %512 = vmatprep.subr.bf16.mxu0 %v581_v17 }
  0x6a   : > { %513 = vmatpush3.bf16.xpose.msra.mxu0 %v582_v18 }
  0x6b   : > { %514 = vmatprep.subr.bf16.mxu0 %v583_v19 }
  0x72   : > { %515 = vmatpush3.bf16.xpose.msra.mxu0 %v584_v20 }
  0x79   : > { %517 = vmatmul.mubr.bf16.vlgmr.msra.gmra.mrb[0].mxu0 %v192_v9 }
  0xbd   : > { %v371_v24 = vpop.permute.xlu0 %370 }
  0xbe   : > { %vm372_vm0 = vcmp.eq.s32.totalorder %v367_v22, %v371_v24  ;;  %vm373_vm1 = vcmp.eq.s32.totalorder %v368_v23, %v371_v24 }
  0xbf   : > { %v374_v26 = vsel %vm372_vm0, 12.8, %v687_v25  ;;  %v375_v28 = vsel %vm373_vm1, 12.8, %v687_v25 }
 0x14c   : > { %v355_v27 = vpop.f32.mrb[0].mxu0 }
 0x14d   : > { %v376_v29 = vmul.f32 64.0, %v355_v27  ;;  %v357_v30 = vpop.f32.mrb[1].mxu0 }
 0x14e   : > { %v377_v31 = vmul.f32 64.0, %v357_v30  ;;  %v359_v32 = vpop.f32.mrb[2].mxu0 }
 0x14f   : > { %v378_v33 = vsub.f32 %v376_v29, %v374_v26  ;;  %v360_v34 = vpop.f32.mrb[3].mxu0 }
 0x150   : > { %v379_v35 = vsub.f32 %v377_v31, %v375_v28 }
 0x151   : > { %380 = vst [vmem:[%s188_s19] sm:$0xff] %v378_v33 }
 0x152   : > { %381 = vst [vmem:[%s188_s19 + $0x8] sm:$0xff] %v379_v35 }
 0x153   : > { %628 = shalt.err (!%p625_p2)
}
 0x154   : > { %s629_s5 = scalar_lea.hbm %s854_s27, 256  ;;  %s633_s23 = scalar_lea.hbm %s901_s3, 512 }
 0x155   : > { %p630_p4 = scmp.ne.s32.totalorder %s854_s27, %s629_s5  ;;  %p634_p9 = scmp.lt.u32.totalorder %s854_s27, %s901_s3 }
 0x156   : > { %p635_p1 = scmp.lt.u32.totalorder %s633_s23, %s629_s5  ;;  %p637_p6 = scmp.lt.u32.totalorder %s629_s5, %s854_s27 }
 0x157   : > { %p631_p5 = pnand %p630_p4, %p908_p11 }
 0x158   : > { %p636_p3 = por %p635_p1, %p634_p9 }
 0x159   : > { %p632_p7 = pneg %p631_p5 }
 0x15a   : > { %p638_p12 = por %p637_p6, %p636_p3 }
 0x15c   : > { %p639_p13 = pnand %p638_p12, %p632_p7 }
 0x15e   : > { %642 = shalt.err (!%p639_p13)
}
 0x15f   : > { %520 = dma.vmem_to_hbm [thread:$0]  (%p908_p11), %s856_s20, 256, %s854_s27, %s383_s28  }
 0x160 PF: > { %s409_s7 = sand.u32 1, %s669_s12   ;;  %p909_p8 = scmp.ne.s32.totalorder %s906_s25, 0 }
 0x161   : > { %p910_p10 = scmp.ge.s32.totalorder %s681_s15, 2  ;;  %s410_s8 = scalar_lea.sflag [#allocation4], %s409_s7 }
 0x163   : > { %p527_p0 = pnand %p910_p10, %p909_p8 }
 0x165   : > { %664 = dma.done.wait (!%p527_p0), %s410_s8, 256  }
 0x166   : > { %666 = vsyncadd (!%p527_p0), %s410_s8, 4294967040  ;;  %p16_p2 = scmp.ge.s32.totalorder %s734_s18, 4   ;;  %s911_s12 = smov %s673_s13 }
 0x167   : > { %s912_s13 = smov %s677_s14  ;;  %s913_s14 = smov %s746_s21 }
 0x168   : > { %s914_s15 = smov %s734_s18  ;;  %18 = sbr.rel (!%p16_p2) target bundleno = 5 (0x5), region = 77 }
 0x16f   :  { %415 = vsyncpa [#allocation3], 1 }
 0x170   :  { %417 = vsyncpa [#allocation3 + $0x1], 1 }
 0x171   :  { %418 = vsyncpa [#allocation4], 1 }
 0x172   :  { %420 = vsyncpa [#allocation4 + $0x1], 1 }

</bundles_post_ra>
